<compile_context>
chip_gen: v6e
topology: v6e:2x2x1
jax: 0.10.0
libtpu: 0.0.40
codegen_flags: <defaults>
</compile_context>

<pallas_src>
import functools

import jax
import jax.numpy as jnp
from jax.experimental import pallas as pl
from jax.experimental.pallas import tpu as pltpu


# ----------------------------- Pallas kernel -------------------------------

def youtube_dnn_kernel(user_emb_ref, item_emb_ref, hist_ref, hlen_ref,
                       uw1a_ref, uw1b_ref, ub1_ref, uw2_ref, ub2_ref,
                       iw1_ref, ib1_ref, iw2_ref, ib2_ref,
                       out_ref, *, hist_l, item_e):
    f32 = jnp.float32
    bf16 = jnp.bfloat16
    tb, lie = hist_ref.shape                       # lie == hist_l * item_e

    # ---- masked history "mean" (torch.mean over zero-padded history: /L, not /len) ----
    # Flattened element j belongs to history position j // item_e, and
    # (j // item_e < len) <=> (j < len * item_e), so no integer division is needed.
    pos = jax.lax.broadcasted_iota(jnp.int32, (tb, lie), 1)          # (tb, L*IE)
    valid = pos < (hlen_ref[...] * item_e)                           # broadcast (tb,1)
    mask = jnp.where(valid, f32(1.0 / hist_l), f32(0.0))             # carries 1/L scale
    hist_m = (hist_ref[...].astype(f32) * mask).astype(bf16)         # (tb, L*IE) bf16

    # ---- user tower: concat(user_emb, hist_rep) @ W1 done as split matmuls; the
    # masked mean over L is folded into the MXU via the L-stacked uw1b weight ----
    h = jnp.dot(user_emb_ref[...], uw1a_ref[...], preferred_element_type=f32)
    h = h + jnp.dot(hist_m, uw1b_ref[...], preferred_element_type=f32)
    h = jnp.tanh(h + ub1_ref[...])                                   # (tb, H1P) f32
    u = jnp.tanh(jnp.dot(h.astype(bf16), uw2_ref[...],
                         preferred_element_type=f32) + ub2_ref[...])  # (tb, H2P) f32

    # ---- item tower ----
    h2 = jnp.tanh(jnp.dot(item_emb_ref[...], iw1_ref[...],
                          preferred_element_type=f32) + ib1_ref[...])
    iv = jnp.tanh(jnp.dot(h2.astype(bf16), iw2_ref[...],
                          preferred_element_type=f32) + ib2_ref[...])  # (tb, H2P) f32

    # ---- score = sigmoid(sum(u * i)); padded H2 slots are exactly zero ----
    out_ref[...] = jax.nn.sigmoid(jnp.sum(u * iv, axis=1, keepdims=True))  # (tb, 1) f32


# ------------------------------- wrapper ------------------------------------

def youtube_dnn_forward(params, x_user, x_item, user_hist, hist_len, *, block_b=512):
    emb = params["embedding"]                       # (V, E) bf16
    B = x_user.shape[0]
    L = user_hist.shape[1]
    E = emb.shape[1]
    IE = user_hist.shape[2] * E                     # item_vec_dim

    # embedding gather (plain-JAX glue; bf16 table halves the gathered HBM bytes)
    # TODO(synk): fuse these gathers into the kernel (manual DMA row gather) to avoid
    # one extra HBM round trip of the dominant hist_emb tensor.
    user_emb = jnp.take(emb, x_user, axis=0).reshape(B, -1)           # (B, UE)    bf16
    item_emb = jnp.take(emb, x_item, axis=0).reshape(B, -1)           # (B, IE)    bf16
    hist_emb = jnp.take(emb, user_hist, axis=0).reshape(B, L * IE)    # (B, L*IE)  bf16
    hlen = hist_len.reshape(B, 1).astype(jnp.int32)                   # (B, 1)

    # batch tile: multiple of 8, large (amortize ~0.35us/step overhead), capped so the
    # grid keeps >= 2 steps (v7x 2-TC sharding).  No padding: ragged last tile is fine,
    # Pallas drops its out-of-bounds writes and all math is row-local.
    tb = max(8, (min(block_b, B) // 8) * 8)
    half = max(8, ((B + 1) // 2 + 7) // 8 * 8)
    tb = min(tb, half)
    grid = (pl.cdiv(B, tb),)

    weights = [params["uw1a"], params["uw1b_s"], params["ub1"],
               params["uw2"], params["ub2"],
               params["iw1"], params["ib1"],
               params["iw2"], params["ib2"]]

    data_specs = [
        pl.BlockSpec((tb, user_emb.shape[1]), lambda b: (b, 0)),
        pl.BlockSpec((tb, item_emb.shape[1]), lambda b: (b, 0)),
        pl.BlockSpec((tb, hist_emb.shape[1]), lambda b: (b, 0)),
        pl.BlockSpec((tb, 1), lambda b: (b, 0)),
    ]
    weight_specs = [pl.BlockSpec(w.shape, lambda b: (0, 0)) for w in weights]

    out = pl.pallas_call(
        functools.partial(youtube_dnn_kernel, hist_l=L, item_e=IE),
        out_shape=jax.ShapeDtypeStruct((B, 1), jnp.float32),
        grid_spec=pltpu.PrefetchScalarGridSpec(
            num_scalar_prefetch=0,
            grid=grid,
            in_specs=data_specs + weight_specs,
            out_specs=pl.BlockSpec((tb, 1), lambda b: (b, 0)),
        ),
        compiler_params=pltpu.CompilerParams(
            dimension_semantics=("parallel",),
            vmem_limit_bytes=32 * 1024 * 1024),
    )(user_emb, item_emb, hist_emb, hlen, *weights)

    return out[:, 0]   # (B,)


# ------------------------ pure-JAX reference (check) -------------------------

def youtube_dnn_reference(params, x_user, x_item, user_hist, hist_len):
    f32 = jnp.float32
    emb = params["embedding"].astype(f32)
    B = x_user.shape[0]
    L = user_hist.shape[1]

    user_emb = jnp.take(emb, x_user, axis=0).reshape(B, -1)
    item_emb = jnp.take(emb, x_item, axis=0).reshape(B, -1)
    hist_emb = jnp.take(emb, user_hist, axis=0).reshape(B, L, -1)
    mask = (jnp.arange(L)[None, :] < hist_len[:, None]).astype(f32)
    hist_rep = jnp.mean(hist_emb * mask[:, :, None], axis=1)

    u_in = jnp.concatenate([user_emb, hist_rep], axis=1)
    h = jnp.tanh(u_in @ params["uw1"] + params["ub1"])
    u = jnp.tanh(h @ params["uw2"] + params["ub2"])

    h2 = jnp.tanh(item_emb @ params["iw1"] + params["ib1"])
    iv = jnp.tanh(h2 @ params["iw2"] + params["ib2"])

    return jax.nn.sigmoid(jnp.sum(u * iv, axis=1))


# --------------------------------- main --------------------------------------

if __name__ == "__main__":
    # config (matches YouTubeDNN.__init__ shape logic), small demo sizes
    vocab_size = 1000
    embed_dim = 16
    user_num_fields = 3
    item_num_fields = 2
    hidden_dims = [64, 32]
    B = 64
    L = 8  # max_hist_len

    UE = user_num_fields * embed_dim          # 48
    IE = item_num_fields * embed_dim          # 32 (item_vec_dim)
    H1, H2 = hidden_dims
    H1P, H2P = 128, 128                       # lane-padded hidden dims (zeros)

    key = jax.random.PRNGKey(0)
    ks = jax.random.split(key, 16)

    def lin(k, fan_in, fan_out):
        bound = 1.0 / jnp.sqrt(fan_in)
        return jax.random.uniform(k, (fan_in, fan_out), jnp.float32, -bound, bound)

    def pad2(w, rows, cols):
        return jnp.pad(w, ((0, rows - w.shape[0]), (0, cols - w.shape[1])))

    # raw f32 parameters (used by the reference)
    emb_f32 = jax.random.normal(ks[0], (vocab_size, embed_dim), jnp.float32) * 0.1
    uw1a = lin(ks[1], UE, H1)
    uw1b = lin(ks[2], IE, H1)
    ub1 = jax.random.normal(ks[3], (1, H1), jnp.float32) * 0.01
    uw2 = lin(ks[4], H1, H2)
    ub2 = jax.random.normal(ks[5], (1, H2), jnp.float32) * 0.01
    iw1 = lin(ks[6], IE, H1)
    ib1 = jax.random.normal(ks[7], (1, H1), jnp.float32) * 0.01
    iw2 = lin(ks[8], H1, H2)
    ib2 = jax.random.normal(ks[9], (1, H2), jnp.float32) * 0.01

    bf16 = jnp.bfloat16
    emb_bf = emb_f32.astype(bf16)

    kernel_params = {
        # bf16 table halves HBM bytes of the gathered (dominant) hist_emb stream
        "embedding": emb_bf,
        # user tower layer 1, split into [user_emb part | hist part], N padded to 128
        "uw1a": pad2(uw1a, UE, H1P).astype(bf16),
        # uw1b stacked L times so the masked mean over history folds into one matmul
        "uw1b_s": jnp.tile(pad2(uw1b, IE, H1P), (L, 1)).astype(bf16),
        "ub1": pad2(ub1, 1, H1P),
        "uw2": pad2(uw2, H1P, H2P).astype(bf16),
        "ub2": pad2(ub2, 1, H2P),
        # item tower
        "iw1": pad2(iw1, IE, H1P).astype(bf16),
        "ib1": pad2(ib1, 1, H1P),
        "iw2": pad2(iw2, H1P, H2P).astype(bf16),
        "ib2": pad2(ib2, 1, H2P),
    }

    ref_params = {
        # same bf16 table (cast to f32) so the only deltas vs the kernel are bf16
        # matmul-operand rounding
        "embedding": emb_bf,
        "uw1": jnp.concatenate([uw1a, uw1b], axis=0),
        "ub1": ub1, "uw2": uw2, "ub2": ub2,
        "iw1": iw1, "ib1": ib1, "iw2": iw2, "ib2": ib2,
    }

    x_user = jax.random.randint(ks[10], (B, user_num_fields), 0, vocab_size)
    x_item = jax.random.randint(ks[11], (B, item_num_fields), 0, vocab_size)
    user_hist = jax.random.randint(ks[12], (B, L, item_num_fields), 0, vocab_size)
    hist_len = jax.random.randint(ks[13], (B,), 1, L + 1)

    # default block_b=512 is production-sized; at this demo batch the >=2-step cap
    # gives tb=32 and a 2-step grid.
    score = youtube_dnn_forward(kernel_params, x_user, x_item, user_hist, hist_len,
                                block_b=512)
    score = jax.block_until_ready(score)

    ref = youtube_dnn_reference(ref_params, x_user, x_item, user_hist, hist_len)
    assert score.shape == (B,)
    # bf16 matmul operands (f32 accumulation) => relaxed tolerance vs f32 reference
    assert jnp.allclose(score, ref, atol=2e-2, rtol=2e-2), (score, ref)

    print("KERNEL_OK")
</pallas_src>

<mosaic_0001>
module attributes {stable_mosaic.version = 11 : i64} {
  func.func @youtube_dnn_kernel(%arg0: i32, %arg1: memref<32x48xbf16, #tpu.memory_space<vmem>>, %arg2: memref<32x32xbf16, #tpu.memory_space<vmem>>, %arg3: memref<32x256xbf16, #tpu.memory_space<vmem>>, %arg4: memref<32x1xi32, #tpu.memory_space<vmem>>, %arg5: memref<48x128xbf16, #tpu.memory_space<vmem>>, %arg6: memref<256x128xbf16, #tpu.memory_space<vmem>>, %arg7: memref<1x128xf32, #tpu.memory_space<vmem>>, %arg8: memref<128x128xbf16, #tpu.memory_space<vmem>>, %arg9: memref<1x128xf32, #tpu.memory_space<vmem>>, %arg10: memref<32x128xbf16, #tpu.memory_space<vmem>>, %arg11: memref<1x128xf32, #tpu.memory_space<vmem>>, %arg12: memref<128x128xbf16, #tpu.memory_space<vmem>>, %arg13: memref<1x128xf32, #tpu.memory_space<vmem>>, %arg14: memref<32x1xf32, #tpu.memory_space<vmem>>) attributes {dimension_semantics = [#tpu.dimension_semantics<parallel>], iteration_bounds = array<i64: 2>, scalar_prefetch = 0 : i64, scratch_operands = 0 : i64, tpu.core_type = #tpu.core_type<tc>, window_params = [{transform_indices = @transform_0, window_bounds = array<i64: 32, 48>}, {transform_indices = @transform_1, window_bounds = array<i64: 32, 32>}, {transform_indices = @transform_2, window_bounds = array<i64: 32, 256>}, {transform_indices = @transform_3, window_bounds = array<i64: 32, 1>}, {pipeline_mode = #tpu.pipeline_mode<synchronous>, transform_indices = @transform_4, window_bounds = array<i64: 48, 128>}, {pipeline_mode = #tpu.pipeline_mode<synchronous>, transform_indices = @transform_5, window_bounds = array<i64: 256, 128>}, {pipeline_mode = #tpu.pipeline_mode<synchronous>, transform_indices = @transform_6, window_bounds = array<i64: 1, 128>}, {pipeline_mode = #tpu.pipeline_mode<synchronous>, transform_indices = @transform_7, window_bounds = array<i64: 128, 128>}, {pipeline_mode = #tpu.pipeline_mode<synchronous>, transform_indices = @transform_8, window_bounds = array<i64: 1, 128>}, {pipeline_mode = #tpu.pipeline_mode<synchronous>, transform_indices = @transform_9, window_bounds = array<i64: 32, 128>}, {pipeline_mode = #tpu.pipeline_mode<synchronous>, transform_indices = @transform_10, window_bounds = array<i64: 1, 128>}, {pipeline_mode = #tpu.pipeline_mode<synchronous>, transform_indices = @transform_11, window_bounds = array<i64: 128, 128>}, {pipeline_mode = #tpu.pipeline_mode<synchronous>, transform_indices = @transform_12, window_bounds = array<i64: 1, 128>}, {transform_indices = @transform_13, window_bounds = array<i64: 32, 1>}]} {
    %0 = tpu.iota {dimensions = array<i32: 1>} : vector<32x256xi32>
    %c0 = arith.constant 0 : index
    %c0_0 = arith.constant 0 : index
    %1 = vector.load %arg4[%c0, %c0_0] : memref<32x1xi32, #tpu.memory_space<vmem>>, vector<32x1xi32>
    %c32_i32 = arith.constant 32 : i32
    %2 = vector.broadcast %c32_i32 : i32 to vector<32x1xi32>
    %3 = arith.muli %1, %2 : vector<32x1xi32>
    %4 = vector.broadcast %3 : vector<32x1xi32> to vector<32x256xi32>
    %5 = arith.cmpi slt, %0, %4 : vector<32x256xi32>
    %cst = arith.constant 1.250000e-01 : f32
    %cst_1 = arith.constant 0.000000e+00 : f32
    %6 = vector.broadcast %cst : f32 to vector<32x256xf32>
    %7 = vector.broadcast %cst_1 : f32 to vector<32x256xf32>
    %8 = arith.select %5, %6, %7 : vector<32x256xi1>, vector<32x256xf32>
    %c0_2 = arith.constant 0 : index
    %c0_3 = arith.constant 0 : index
    %9 = vector.load %arg3[%c0_2, %c0_3] : memref<32x256xbf16, #tpu.memory_space<vmem>>, vector<32x256xbf16>
    %10 = arith.extf %9 : vector<32x256xbf16> to vector<32x256xf32>
    %11 = arith.mulf %10, %8 : vector<32x256xf32>
    %12 = arith.truncf %11 : vector<32x256xf32> to vector<32x256xbf16>
    %c0_4 = arith.constant 0 : index
    %c0_5 = arith.constant 0 : index
    %13 = vector.load %arg1[%c0_4, %c0_5] : memref<32x48xbf16, #tpu.memory_space<vmem>>, vector<32x48xbf16>
    %c0_6 = arith.constant 0 : index
    %c0_7 = arith.constant 0 : index
    %14 = vector.load %arg5[%c0_6, %c0_7] : memref<48x128xbf16, #tpu.memory_space<vmem>>, vector<48x128xbf16>
    %cst_8 = arith.constant dense<0.000000e+00> : vector<32x128xf32>
    %15 = tpu.matmul %13, %14, %cst_8 {dimension_numbers = #tpu.dot_dimension_numbers<[1], [0], [0], [1], [0, 0, 1, 1], [], []>} : vector<32x48xbf16>, vector<48x128xbf16>, vector<32x128xf32> -> vector<32x128xf32>
    %c0_9 = arith.constant 0 : index
    %c0_10 = arith.constant 0 : index
    %16 = vector.load %arg6[%c0_9, %c0_10] : memref<256x128xbf16, #tpu.memory_space<vmem>>, vector<256x128xbf16>
    %cst_11 = arith.constant dense<0.000000e+00> : vector<32x128xf32>
    %17 = tpu.matmul %12, %16, %cst_11 {dimension_numbers = #tpu.dot_dimension_numbers<[1], [0], [0], [1], [0, 0, 1, 1], [], []>} : vector<32x256xbf16>, vector<256x128xbf16>, vector<32x128xf32> -> vector<32x128xf32>
    %18 = arith.addf %15, %17 : vector<32x128xf32>
    %c0_12 = arith.constant 0 : index
    %c0_13 = arith.constant 0 : index
    %19 = vector.load %arg7[%c0_12, %c0_13] : memref<1x128xf32, #tpu.memory_space<vmem>>, vector<1x128xf32>
    %20 = vector.broadcast %19 : vector<1x128xf32> to vector<32x128xf32>
    %21 = arith.addf %18, %20 : vector<32x128xf32>
    %22 = math.tanh %21 : vector<32x128xf32>
    %23 = arith.truncf %22 : vector<32x128xf32> to vector<32x128xbf16>
    %c0_14 = arith.constant 0 : index
    %c0_15 = arith.constant 0 : index
    %24 = vector.load %arg8[%c0_14, %c0_15] : memref<128x128xbf16, #tpu.memory_space<vmem>>, vector<128x128xbf16>
    %cst_16 = arith.constant dense<0.000000e+00> : vector<32x128xf32>
    %25 = tpu.matmul %23, %24, %cst_16 {dimension_numbers = #tpu.dot_dimension_numbers<[1], [0], [0], [1], [0, 0, 1, 1], [], []>} : vector<32x128xbf16>, vector<128x128xbf16>, vector<32x128xf32> -> vector<32x128xf32>
    %c0_17 = arith.constant 0 : index
    %c0_18 = arith.constant 0 : index
    %26 = vector.load %arg9[%c0_17, %c0_18] : memref<1x128xf32, #tpu.memory_space<vmem>>, vector<1x128xf32>
    %27 = vector.broadcast %26 : vector<1x128xf32> to vector<32x128xf32>
    %28 = arith.addf %25, %27 : vector<32x128xf32>
    %29 = math.tanh %28 : vector<32x128xf32>
    %c0_19 = arith.constant 0 : index
    %c0_20 = arith.constant 0 : index
    %30 = vector.load %arg2[%c0_19, %c0_20] : memref<32x32xbf16, #tpu.memory_space<vmem>>, vector<32x32xbf16>
    %c0_21 = arith.constant 0 : index
    %c0_22 = arith.constant 0 : index
    %31 = vector.load %arg10[%c0_21, %c0_22] : memref<32x128xbf16, #tpu.memory_space<vmem>>, vector<32x128xbf16>
    %cst_23 = arith.constant dense<0.000000e+00> : vector<32x128xf32>
    %32 = tpu.matmul %30, %31, %cst_23 {dimension_numbers = #tpu.dot_dimension_numbers<[1], [0], [0], [1], [0, 0, 1, 1], [], []>} : vector<32x32xbf16>, vector<32x128xbf16>, vector<32x128xf32> -> vector<32x128xf32>
    %c0_24 = arith.constant 0 : index
    %c0_25 = arith.constant 0 : index
    %33 = vector.load %arg11[%c0_24, %c0_25] : memref<1x128xf32, #tpu.memory_space<vmem>>, vector<1x128xf32>
    %34 = vector.broadcast %33 : vector<1x128xf32> to vector<32x128xf32>
    %35 = arith.addf %32, %34 : vector<32x128xf32>
    %36 = math.tanh %35 : vector<32x128xf32>
    %37 = arith.truncf %36 : vector<32x128xf32> to vector<32x128xbf16>
    %c0_26 = arith.constant 0 : index
    %c0_27 = arith.constant 0 : index
    %38 = vector.load %arg12[%c0_26, %c0_27] : memref<128x128xbf16, #tpu.memory_space<vmem>>, vector<128x128xbf16>
    %cst_28 = arith.constant dense<0.000000e+00> : vector<32x128xf32>
    %39 = tpu.matmul %37, %38, %cst_28 {dimension_numbers = #tpu.dot_dimension_numbers<[1], [0], [0], [1], [0, 0, 1, 1], [], []>} : vector<32x128xbf16>, vector<128x128xbf16>, vector<32x128xf32> -> vector<32x128xf32>
    %c0_29 = arith.constant 0 : index
    %c0_30 = arith.constant 0 : index
    %40 = vector.load %arg13[%c0_29, %c0_30] : memref<1x128xf32, #tpu.memory_space<vmem>>, vector<1x128xf32>
    %41 = vector.broadcast %40 : vector<1x128xf32> to vector<32x128xf32>
    %42 = arith.addf %39, %41 : vector<32x128xf32>
    %43 = math.tanh %42 : vector<32x128xf32>
    %44 = arith.mulf %29, %43 : vector<32x128xf32>
    %cst_31 = arith.constant dense<0.000000e+00> : vector<32xf32>
    %45 = vector.multi_reduction <add>, %44, %cst_31 [1] : vector<32x128xf32> to vector<32xf32>
    %46 = vector.shape_cast %45 : vector<32xf32> to vector<32x1xf32>
    %47 = arith.negf %46 : vector<32x1xf32>
    %48 = math.exp %47 : vector<32x1xf32>
    %cst_32 = arith.constant 1.000000e+00 : f32
    %49 = vector.broadcast %cst_32 : f32 to vector<32x1xf32>
    %50 = arith.addf %49, %48 : vector<32x1xf32>
    %51 = arith.divf %49, %50 : vector<32x1xf32>
    %c0_33 = arith.constant 0 : index
    %c0_34 = arith.constant 0 : index
    %52 = vector.load %arg14[%c0_33, %c0_34] : memref<32x1xf32, #tpu.memory_space<vmem>>, vector<32x1xf32>
    tpu.vector_store %arg14[%c0_33, %c0_34], %51 {strides = array<i32>} : memref<32x1xf32, #tpu.memory_space<vmem>>, vector<32x1xf32>,
    return
  }
  func.func @transform_0(%arg0: i32) -> (i32, i32) {
    %c0_i32 = arith.constant 0 : i32
    %c0_i32_0 = arith.constant 0 : i32
    return %arg0, %c0_i32 : i32, i32
  }
  func.func @transform_1(%arg0: i32) -> (i32, i32) {
    %c0_i32 = arith.constant 0 : i32
    %c0_i32_0 = arith.constant 0 : i32
    return %arg0, %c0_i32 : i32, i32
  }
  func.func @transform_2(%arg0: i32) -> (i32, i32) {
    %c0_i32 = arith.constant 0 : i32
    %c0_i32_0 = arith.constant 0 : i32
    return %arg0, %c0_i32 : i32, i32
  }
  func.func @transform_3(%arg0: i32) -> (i32, i32) {
    %c0_i32 = arith.constant 0 : i32
    %c0_i32_0 = arith.constant 0 : i32
    return %arg0, %c0_i32 : i32, i32
  }
  func.func @transform_4(%arg0: i32) -> (i32, i32) {
    %c0_i32 = arith.constant 0 : i32
    %c0_i32_0 = arith.constant 0 : i32
    %c0_i32_1 = arith.constant 0 : i32
    return %c0_i32, %c0_i32_0 : i32, i32
  }
  func.func @transform_5(%arg0: i32) -> (i32, i32) {
    %c0_i32 = arith.constant 0 : i32
    %c0_i32_0 = arith.constant 0 : i32
    %c0_i32_1 = arith.constant 0 : i32
    return %c0_i32, %c0_i32_0 : i32, i32
  }
  func.func @transform_6(%arg0: i32) -> (i32, i32) {
    %c0_i32 = arith.constant 0 : i32
    %c0_i32_0 = arith.constant 0 : i32
    %c0_i32_1 = arith.constant 0 : i32
    return %c0_i32, %c0_i32_0 : i32, i32
  }
  func.func @transform_7(%arg0: i32) -> (i32, i32) {
    %c0_i32 = arith.constant 0 : i32
    %c0_i32_0 = arith.constant 0 : i32
    %c0_i32_1 = arith.constant 0 : i32
    return %c0_i32, %c0_i32_0 : i32, i32
  }
  func.func @transform_8(%arg0: i32) -> (i32, i32) {
    %c0_i32 = arith.constant 0 : i32
    %c0_i32_0 = arith.constant 0 : i32
    %c0_i32_1 = arith.constant 0 : i32
    return %c0_i32, %c0_i32_0 : i32, i32
  }
  func.func @transform_9(%arg0: i32) -> (i32, i32) {
    %c0_i32 = arith.constant 0 : i32
    %c0_i32_0 = arith.constant 0 : i32
    %c0_i32_1 = arith.constant 0 : i32
    return %c0_i32, %c0_i32_0 : i32, i32
  }
  func.func @transform_10(%arg0: i32) -> (i32, i32) {
    %c0_i32 = arith.constant 0 : i32
    %c0_i32_0 = arith.constant 0 : i32
    %c0_i32_1 = arith.constant 0 : i32
    return %c0_i32, %c0_i32_0 : i32, i32
  }
  func.func @transform_11(%arg0: i32) -> (i32, i32) {
    %c0_i32 = arith.constant 0 : i32
    %c0_i32_0 = arith.constant 0 : i32
    %c0_i32_1 = arith.constant 0 : i32
    return %c0_i32, %c0_i32_0 : i32, i32
  }
  func.func @transform_12(%arg0: i32) -> (i32, i32) {
    %c0_i32 = arith.constant 0 : i32
    %c0_i32_0 = arith.constant 0 : i32
    %c0_i32_1 = arith.constant 0 : i32
    return %c0_i32, %c0_i32_0 : i32, i32
  }
  func.func @transform_13(%arg0: i32) -> (i32, i32) {
    %c0_i32 = arith.constant 0 : i32
    %c0_i32_0 = arith.constant 0 : i32
    return %arg0, %c0_i32 : i32, i32
  }
}

</mosaic_0001>

<bundles_post_ra>
// kernel: tpu_custom_call.1
= control target key start
LH: loop header
LB: loop body
LE: loop exit
PB: predicated region body
PF: predicated region fallthrough
CT: control target
= control target key end

     0   :  { %s2221_s0 = inlined_call_operand.vmem [shape: bf16[64,48], index: 0, kind: input, shape index: {}]   ;;  %s2222_s1 = inlined_call_operand.vmem [shape: bf16[64,32], index: 1, kind: input, shape index: {}]   ;;  %s2223_s2 = inlined_call_operand.hbm [shape: bf16[64,256], index: 2, kind: input, shape index: {}]   ;;  %s2224_s3 = inlined_call_operand.vmem [shape: s32[64,1], index: 3, kind: input, shape index: {}]   ;;  %s2225_s4 = inlined_call_operand.vmem [shape: bf16[48,128], index: 4, kind: input, shape index: {}]   ;;  %s2226_s5 = inlined_call_operand.vmem [shape: bf16[256,128], index: 5, kind: input, shape index: {}]   ;;  %s2227_s6 = inlined_call_operand.vmem [shape: f32[1,128], index: 6, kind: input, shape index: {}]   ;;  %s2228_s7 = inlined_call_operand.hbm [shape: bf16[128,128], index: 7, kind: input, shape index: {}]   ;;  %s2229_s8 = inlined_call_operand.vmem [shape: f32[1,128], index: 8, kind: input, shape index: {}]   ;;  %s2230_s9 = inlined_call_operand.vmem [shape: bf16[32,128], index: 9, kind: input, shape index: {}]   ;;  %s2231_s10 = inlined_call_operand.vmem [shape: f32[1,128], index: 10, kind: input, shape index: {}]   ;;  %s2232_s11 = inlined_call_operand.hbm [shape: bf16[128,128], index: 11, kind: input, shape index: {}]   ;;  %s2233_s12 = inlined_call_operand.vmem [shape: f32[1,128], index: 12, kind: input, shape index: {}]   ;;  %s2234_s13 = inlined_call_operand.vmem [shape: f32[64,1], index: 13, kind: output, shape index: {}]  }
   0x1   :  { %2240 = sst [smem:[#allocation10_spill]] %s2228_s7 }
   0x2   :  { %2241 = sst [smem:[#allocation11_spill]] %s2232_s11 }
   0x3   :  { %2242 = sst [smem:[#allocation12_spill]] %s2234_s13 }
   0x4   :  { %18 = vsyncpa [#allocation3], 0 }
   0x5   :  { %20 = vsyncpa [#allocation3 + $0x1], 0 }
   0x6   :  { %21 = vsyncpa [#allocation5], 0  ;;  %s1971_s25 = smov 0   ;;  %s1973_s26 = smov 0  }
   0x7   :  { %s1975_s27 = smov 0   ;;  %s1977_s28 = smov 0  }
   0x8 LB: > { %s2237_s29 = sadd.s32 4294967295, %s1890_s28   ;;  %p99_p0 = scmp.ne.s32.totalorder %s1882_s26, %s1878_s25  ;;  %s1890_s28 = sphi %s1977_s28, %s2260_s28   ;;  %s1886_s27 = sphi %s1975_s27, %s2259_s27   ;;  %s1882_s26 = sphi %s1973_s26, %s2258_s26   ;;  %s1878_s25 = sphi %s1971_s25, %s2257_s25  }
   0x9   : > { %p1993_p1 = scmp.eq.s32.totalorder %s2237_s29, 0  ;;  %p1423_p2 = scmp.ge.s32.totalorder %s1890_s28, 1 }
   0xa   : > { %p351_p3 = scmp.lt.s32.totalorder %s1890_s28, 3  ;;  %s1892_s16 = smov [#allocation4]  }
   0xb   : > { %s2243_s30 = scalar_select %p1993_p1, 1, 0 }
   0xc   : > { %p2001_p4 = por %p1993_p1, %p99_p0  ;;  %p2005_p5 = pnand %p1423_p2, %p351_p3 }
   0xd   : > { %s372_s17 = sshll.u32 %s1892_s16, 4  ;;  %s1893_s19 = smov [#allocation6]   ;;  %s373_s17 = int_to_ptr.vmem [resolvable:$true] %s372_s17 }
   0xe   : > { %s2244_s14 = scalar_select %p2001_p4, 1, 0 }
   0xf   : > { %s2245_s15 = scalar_select %p2005_p5, 1, 0 }
  0x10   : > { %p1625_p6 = pneg %p2005_p5  ;;  %s394_s20 = sshll.u32 %s1893_s19, 4  ;;  %s395_s20 = int_to_ptr.vmem [resolvable:$true] %s394_s20 }
  0x11   : > { %s1783_s21 = scalar_lea.vmem %s373_s17, 1024  ;;  %p1791_p12 = scmp.lt.s32.totalorder %s373_s17, %s373_s17 }
  0x12   : > { %p2013_p7 = pnand %p1625_p6, %p1993_p1  ;;  %p1784_p9 = scmp.ne.s32.totalorder %s373_s17, %s1783_s21 }
  0x13   : > { %p1792_p13 = scmp.lt.s32.totalorder %s1783_s21, %s1783_s21 }
  0x14   : > { %p1774_p8 = pneg %p2013_p7 }
  0x15   : > { %p1793_p0 = por %p1792_p13, %p1791_p12 }
  0x16   : > { %p1786_p10 = pnand %p1784_p9, %p1774_p8 }
  0x18   : > { %p1787_p11 = pneg %p1786_p10 }
  0x1a   : > { %p1794_p2 = pnand %p1793_p0, %p1787_p11 }
  0x1c   : > { %1797 = shalt.err (!%p1794_p2)
}
  0x1d   : > { %s1894_s22 = smov 64   ;;  %s1895_s23 = smov 4  }
  0x1e   : > { %s2247_s7 = sld [smem:[#allocation10_spill]]  ;;  %s1809_s16 = scalar_lea.vmem %s395_s20, 1024 }
  0x1f   : > { %p1810_p3 = scmp.ne.s32.totalorder %s395_s20, %s1809_s16  ;;  %p1817_p10 = scmp.lt.s32.totalorder %s395_s20, %s395_s20 }
  0x20   : > { %p1818_p1 = scmp.lt.s32.totalorder %s1809_s16, %s1809_s16 }
  0x21   : > { %p1812_p6 = pnand %p1810_p3, %p1774_p8 }
  0x22   : > { %p1819_p12 = por %p1818_p1, %p1817_p10 }
  0x23   : > { %p1813_p9 = pneg %p1812_p6 }
  0x24   : > { %1628 = dma.hbm_to_vmem [thread:$0]  (!%p2013_p7), %s2247_s7, 1024, %s373_s17, [#allocation5], %s1894_s22, %s1894_s22, %s1895_s23  }
  0x25   : > { %p1820_p11 = pnand %p1819_p12, %p1813_p9 }
  0x27   : > { %1823 = shalt.err (!%p1820_p11)
}
  0x28   : > { %s2248_s11 = sld [smem:[#allocation11_spill]]  ;;  %s2036_s17 = sadd.s32 1, %s1890_s28  }
  0x29   : > { %s86_s24 = sadd.s32 1, %s1886_s27  ;;  %s83_s25 = ssub.s32 %s1890_s28, %s2036_s17 }
  0x2a   : > { %p93_p1 = scmp.ne.s32.totalorder %s1886_s27, %s1882_s26  ;;  %p84_p8 = scmp.eq.s32.totalorder %s83_s25, 0 }
  0x2b   : > { %p94_p13 = scmp.eq.s32.totalorder %s1890_s28, 0  ;;  %p1638_p0 = scmp.lt.s32.totalorder %s1890_s28, 2 }
  0x2c   : > { %s429_s18 = sand.u32 1, %s1886_s27   ;;  %s1499_s21 = sshll.u32 %s1890_s28, 9 }
  0x2d   : > { %s2047_s16 = scalar_select %p84_p8, %s1886_s27, %s86_s24  }
  0x2e   : > { %1631 = dma.hbm_to_vmem [thread:$0]  (!%p2013_p7), %s2248_s11, 1024, %s395_s20, [#allocation5], %s1894_s22, %s1894_s22, %s1895_s23  }
  0x2f   : > { %2249 = sst [smem:[#allocation9_spill]] %s2047_s16  ;;  %p95_p2 = por %p94_p13, %p93_p1 }
  0x30   : > { %s1427_s19 = sshll.u32 %s429_s18, 5  ;;  %s2053_s13 = scalar_lea.hbm %s2223_s2, %s1499_s21 }
  0x31   : > { %s433_s20 = scalar_lea.vmem [#allocation2], %s1427_s19  ;;  %p2055_p7 = pnand %p1638_p0, %p95_p2 }
  0x32   : > { %s441_s22 = sshll.u32 %s433_s20, 4  ;;  %s2061_s24 = scalar_lea.sflag [#allocation3], %s429_s18  ;;  %s2059_s22 = int_to_ptr.vmem [resolvable:$true] %s441_s22 }
  0x33   : > { %s1824_s25 = scalar_lea.hbm %s2053_s13, 512  ;;  %p1826_p6 = pneg %p2055_p7 }
  0x34   : > { %p1825_p3 = scmp.ne.s32.totalorder %s2053_s13, %s1824_s25  ;;  %s1829_s19 = scalar_lea.hbm %s2223_s2, 1024 }
  0x35   : > { %p1830_p12 = scmp.lt.s32.totalorder %s2053_s13, %s2223_s2  ;;  %p1831_p11 = scmp.lt.s32.totalorder %s1829_s19, %s1824_s25 }
  0x36   : > { %p1827_p9 = pnand %p1826_p6, %p1825_p3 }
  0x37   : > { %p1832_p1 = por %p1831_p11, %p1830_p12 }
  0x38   : > { %p1828_p10 = pneg %p1827_p9 }
  0x3a   : > { %p1833_p8 = pnand %p1832_p1, %p1828_p10 }
  0x3c   : > { %1836 = shalt.err (!%p1833_p8)
}
  0x3d   : > { %s1837_s18 = scalar_lea.vmem %s2059_s22, 512  ;;  %s1896_s11 = smov [#allocation2]  }
  0x3e   : > { %p1838_p13 = scmp.ne.s32.totalorder %s2059_s22, %s1837_s18  ;;  %s1842_s16 = sshll.u32 %s1896_s11, 4  ;;  %s1843_s16 = int_to_ptr.vmem [resolvable:$false] %s1842_s16 }
  0x3f   : > { %s1844_s7 = scalar_lea.vmem %s1843_s16, 1024  ;;  %p1845_p3 = scmp.lt.s32.totalorder %s2059_s22, %s1843_s16 }
  0x40   : > { %p1840_p0 = pnand %p1838_p13, %p1826_p6  ;;  %p1846_p9 = scmp.lt.s32.totalorder %s1844_s7, %s1837_s18 }
  0x42   : > { %p1841_p2 = pneg %p1840_p0  ;;  %p1847_p4 = por %p1846_p9, %p1845_p3 }
  0x44   : > { %p1848_p5 = pnand %p1847_p4, %p1841_p2 }
  0x46   : > { %1851 = shalt.err (!%p1848_p5)
}
  0x47   : > { %s1897_s25 = smov 128   ;;  %s1898_s29 = smov 8  }
  0x48   : > { %1635 = dma.hbm_to_vmem [thread:$0]  (!%p2055_p7), %s2053_s13, 512, %s2059_s22, %s2061_s24, %s1897_s25, %s1897_s25, %s1898_s29  }
  0x49   : > { %p2251_p6 = scmp.ne.s32.totalorder %s2245_s15, 0 }
  0x4a   : > { %s464_s11 = sand.u32 (!%p2251_p6), 1, %s1882_s26   ;;  %p2252_p4 = scmp.ne.s32.totalorder (!%p2251_p6), %s2244_s14, 0 }
  0x4b   : > { %462 = sbr.rel (%p2251_p6) target bundleno = 889 (0x379), region = 72  ;;  %s1432_s19 = sshll.u32 (!%p2251_p6), %s464_s11, 5 }
  0x4c   : > { %s465_s16 = scalar_lea.sflag (!%p2251_p6), [#allocation3], %s464_s11  ;;  %s2085_s21 = scalar_lea.vmem (!%p2251_p6), [#allocation2], %s1432_s19 }
  0x50   : > { %1869 = dma.done.wait (%p2252_p4), %s465_s16, 512  }
  0x51   : > { %1871 = vsyncadd (%p2252_p4), %s465_s16, 4294966784  ;;  %p2253_p5 = scmp.ne.s32.totalorder %s2243_s30, 0 }
  0x53   : > { %1873 = dma.done.wait (%p2253_p5), [#allocation5], 2048  }
  0x54   : > { %1875 = vsyncadd (%p2253_p5), [#allocation5], 4294965248  ;;  %s2254_s13 = sadd.s32 4294967295, %s1890_s28   ;;  %v1899_v0 = vmov 0   ;;  %v1684_v7 = vld [vmem:[%s2226_s5 + $0x78] sm:$0xff]   ;;  %v1686_v11 = vld [vmem:[%s2226_s5 + $0x70] sm:$0xff]   ;;  %v560_v26 = vlaneseq }
  0x55   : > { %s1435_s15 = sshll.u32 %s2254_s13, 2  ;;  %1681 = vset.pattern.permute.xlu0 %v1899_v0  ;;  %1682 = vset.pattern.permute.xlu1 %v1899_v0  ;;  %v1685_v10 = vld [vmem:[%s2226_s5 + $0x38] sm:$0xff]   ;;  %v1687_v12 = vld [vmem:[%s2226_s5 + $0x30] sm:$0xff]   ;;  %v1688_v13 = vld [vmem:[%s2226_s5 + $0x68] sm:$0xff]   ;;  %v1900_v37 = vmov 0.0   ;;  %vm838_vm8 = vcmask 392192  }
  0x56   : > { %p535_p7 = scmp.lt.s32.totalorder %s1435_s15, 7  ;;  %1500 = vmatprep.subr.bf16.mxu0 %v1684_v7  ;;  %v1689_v14 = vld [vmem:[%s2226_s5 + $0x28] sm:$0xff]   ;;  %v1690_v15 = vld [vmem:[%s2226_s5 + $0x60] sm:$0xff]   ;;  %v1692_v17 = vld [vmem:[%s2226_s5 + $0x58] sm:$0xff]   ;;  %v561_v27 = vand.u32 127, %v560_v26  ;;  %vm1072_vm9 = vcmask 261120  }
  0x57   : > { %1501 = vmatpush3.bf16.msra.mxu0 %v1685_v10  ;;  %v1691_v16 = vld [vmem:[%s2226_s5 + $0x20] sm:$0xff]   ;;  %v1693_v18 = vld [vmem:[%s2226_s5 + $0x18] sm:$0xff]   ;;  %v1694_v19 = vld [vmem:[%s2226_s5 + $0x50] sm:$0xff]   ;;  %s2255_s29 = sld [smem:[#allocation12_spill]]  ;;  %vm1294_vm10 = vcmask 7168  }
  0x58   : > { %s2262_s15 = smov (!%p535_p7, %s1435_s15), 7  ;;  %1502 = vmatprep.subr.bf16.mxu0 %v1686_v11  ;;  %v1695_v20 = vld [vmem:[%s2226_s5 + $0x10] sm:$0xff]   ;;  %v1696_v21 = vld [vmem:[%s2226_s5 + $0x48] sm:$0xff]   ;;  %v1698_v23 = vld [vmem:[%s2226_s5 + $0x40] sm:$0xff]   ;;  %v562_v28 = vadd.s32 128, %v561_v27 }
  0x59   : > { %s1436_s14 = sshll.u32 %s2262_s15, 2  ;;  %s1440_s22 = sshll.u32 %s2262_s15, 3  ;;  %v1697_v22 = vld [vmem:[%s2226_s5 + $0x8] sm:$0xff]   ;;  %v1699_v24 = vld [vmem:[%s2226_s5] sm:$0xff]   ;;  %v1700_v25 = vld [vmem:[%s2225_s4 + $0x10] sm:$0xff]  }
  0x5a   : > { %s2106_s30 = scalar_lea.vmem %s2221_s0, %s1436_s14  ;;  %s551_s18 = scalar_lea.vmem %s2224_s3, %s1440_s22  ;;  %v601_v29 = vld [vmem:[%s2085_s21 + $0x10] sm:$0xff]  ;;  %v599_v30 = vld [vmem:[%s2085_s21] sm:$0xff]  ;;  %v600_v33 = vld [vmem:[%s2085_s21 + $0x8] sm:$0xff] }
  0x5b   : > { %v563_v1 = vld [vmem:[%s551_s18] sm:$0xff]  ;;  %v565_v2 = vld [vmem:[%s551_s18 + $0x10] sm:$0xff]  ;;  %v564_v3 = vld [vmem:[%s551_s18 + $0x8] sm:$0xff]  ;;  %1503 = vmatpush3.bf16.msra.mxu0 %v1687_v12  ;;  %s2157_s19 = scalar_lea.vmem %s2222_s1, %s1436_s14  ;;  %v608_v35 = vunpack.c.h.bf16 %v601_v29  ;;  %v603_v36 = vunpack.c.l.bf16 %v599_v30  ;;  %v604_v39 = vunpack.c.h.bf16 %v599_v30  ;;  %v605_v41 = vunpack.c.l.bf16 %v600_v33 }
  0x5c   : > { %v567_v4 = vmul.u32 32, %v563_v1  ;;  %v569_v5 = vmul.u32 32, %v565_v2  ;;  %v566_v6 = vld [vmem:[%s551_s18 + $0x18] sm:$0xff]  ;;  %1504 = vmatprep.subr.bf16.mxu0 %v1688_v13  ;;  %v606_v43 = vunpack.c.h.bf16 %v600_v33  ;;  %v607_v59 = vunpack.c.l.bf16 %v601_v29  ;;  %v1701_v61 = vld [vmem:[%s2225_s4 + $0x8] sm:$0xff]   ;;  %v1702_v2 = vld [vmem:[%s2225_s4] sm:$0xff]  }
  0x5d   : > { %v568_v8 = vmul.u32 32, %v564_v3  ;;  %v570_v9 = vmul.u32 32, %v566_v6  ;;  %v602_v34 = vld [vmem:[%s2085_s21 + $0x18] sm:$0xff]  ;;  %v1703_v3 = vld [vmem:[%s2106_s30] sm:$0xff]   ;;  %v1683_v6 = vld [vmem:[%s2106_s30 + $0x8] sm:$0xff]   ;;  %s557_s11 = scalar_lea.vmem %s2255_s29, %s1440_s22 }
  0x5e   : > { %572 = vperm.xlu0 %1681, %v567_v4   ;;  %578 = vperm.xlu1 %1682, %v569_v5   ;;  %v610_v42 = vunpack.c.h.bf16 %v602_v34  ;;  %v609_v60 = vunpack.c.l.bf16 %v602_v34  ;;  %v1704_v5 = vld [vmem:[%s2230_s9 + $0x8] sm:$0xff]   ;;  %v1706_v7 = vld [vmem:[%s2157_s19] sm:$0xff]   ;;  %v1708_v10 = vld [vmem:[#allocation4 + $0x38] sm:$0xff]  }
  0x5f   : > { %1505 = vmatpush3.bf16.msra.mxu0 %v1689_v14  ;;  %1567 = vmatprep.subr.bf16.mxu1 %v1708_v10  ;;  %v1709_v11 = vld [vmem:[#allocation4 + $0x30] sm:$0xff]   ;;  %v1710_v12 = vld [vmem:[#allocation4 + $0x28] sm:$0xff]   ;;  %v1711_v13 = vld [vmem:[#allocation4 + $0x20] sm:$0xff]  }
  0x60   : > { %1506 = vmatprep.subr.bf16.mxu0 %v1690_v15  ;;  %1568 = vmatpush3.bf16.msra.mxu1 %v1708_v10  ;;  %v1712_v14 = vld [vmem:[#allocation4 + $0x18] sm:$0xff]   ;;  %v1713_v15 = vld [vmem:[#allocation4 + $0x10] sm:$0xff]   ;;  %v1466_v34 = vld [vmem:[%s2227_s6] ss:$0 sm:$0xff] }
  0x61   : > { %1569 = vmatprep.subr.bf16.mxu1 %v1709_v11 }
  0x62   : > { %575 = vperm.xlu0 %1681, %v568_v8   ;;  %581 = vperm.xlu1 %1682, %v570_v9   ;;  %v1705_v8 = vld [vmem:[%s2230_s9] sm:$0xff]   ;;  %v1707_v9 = vld [vmem:[%s2157_s19 + $0x8] sm:$0xff]  }
  0x63   : > { %1507 = vmatpush3.bf16.msra.mxu0 %v1691_v16  ;;  %v1714_v16 = vld [vmem:[#allocation4 + $0x8] sm:$0xff]  }
  0x64   : > { %1508 = vmatprep.subr.bf16.mxu0 %v1692_v17  ;;  %1570 = vmatpush3.bf16.msra.mxu1 %v1709_v11  ;;  %v1715_v17 = vld [vmem:[#allocation4] sm:$0xff]  }
  0x65   : > { %1571 = vmatprep.subr.bf16.mxu1 %v1710_v12 }
  0x67   : > { %1509 = vmatpush3.bf16.msra.mxu0 %v1693_v18  ;;  %v1716_v18 = vld [vmem:[#allocation6 + $0x38] sm:$0xff]  }
  0x68   : > { %1510 = vmatprep.subr.bf16.mxu0 %v1694_v19  ;;  %1572 = vmatpush3.bf16.msra.mxu1 %v1710_v12  ;;  %v1467_v12 = vld [vmem:[%s2229_s8] ss:$0 sm:$0xff] }
  0x69   : > { %1573 = vmatprep.subr.bf16.mxu1 %v1711_v13 }
  0x6b   : > { %1511 = vmatpush3.bf16.msra.mxu0 %v1695_v20 }
  0x6c   : > { %1512 = vmatprep.subr.bf16.mxu0 %v1696_v21  ;;  %1574 = vmatpush3.bf16.msra.mxu1 %v1711_v13 }
  0x6d   : > { %1575 = vmatprep.subr.bf16.mxu1 %v1712_v14 }
  0x6f   : > { %1513 = vmatpush3.bf16.msra.mxu0 %v1697_v22 }
  0x70   : > { %1514 = vmatprep.subr.bf16.mxu0 %v1698_v23  ;;  %1576 = vmatpush3.bf16.msra.mxu1 %v1712_v14 }
  0x71   : > { %1577 = vmatprep.subr.bf16.mxu1 %v1713_v15 }
  0x73   : > { %1515 = vmatpush3.bf16.msra.mxu0 %v1699_v24 }
  0x74   : > { %1557 = vmatprep.subr.bf16.mxu0 %v1700_v25  ;;  %1578 = vmatpush3.bf16.msra.mxu1 %v1713_v15  ;;  %v1483_v15 = vld [vmem:[%s2233_s12] ss:$0 sm:$0xff] }
  0x75   : > { %1579 = vmatprep.subr.bf16.mxu1 %v1714_v16 }
  0x78   : > { %1580 = vmatpush3.bf16.msra.mxu1 %v1714_v16 }
  0x79   : > { %1581 = vmatprep.subr.bf16.mxu1 %v1715_v17 }
  0x7c   : > { %1582 = vmatpush3.bf16.msra.mxu1 %v1715_v17 }
  0x7d   : > { %1595 = vmatprep.subr.bf16.mxu1 %v1716_v18 }
  0xd9   : > { %v573_v31 = vpop.permute.xlu0 %572  ;;  %v579_v32 = vpop.permute.xlu1 %578 }
  0xda   : > { %vm583_vm0 = vcmp.lt.s32.totalorder %v561_v27, %v573_v31  ;;  %vm584_vm1 = vcmp.lt.s32.totalorder %v562_v28, %v573_v31  ;;  %vm588_vm2 = vcmp.lt.s32.totalorder %v562_v28, %v579_v32  ;;  %vm587_vm6 = vcmp.lt.s32.totalorder %v561_v27, %v579_v32 }
  0xdb   : > { %v596_v38 = vsel %vm588_vm2, 0.125, %v1900_v37  ;;  %v591_v40 = vsel %vm583_vm0, 0.125, %v1900_v37  ;;  %v592_v44 = vsel %vm584_vm1, 0.125, %v1900_v37  ;;  %v595_v62 = vsel %vm587_vm6, 0.125, %v1900_v37 }
  0xdc   : > { %v616_v47 = vmul.f32 %v608_v35, %v596_v38  ;;  %v611_v48 = vmul.f32 %v603_v36, %v591_v40  ;;  %v612_v54 = vmul.f32 %v604_v39, %v592_v44  ;;  %v615_v0 = vmul.f32 %v607_v59, %v595_v62  ;;  %v1476_v44 = vld [vmem:[%s2231_s10] ss:$0 sm:$0xff] }
  0xdd   : > { %v576_v45 = vpop.permute.xlu0 %575  ;;  %v582_v46 = vpop.permute.xlu1 %581  ;;  %v1719_v62 = vld [vmem:[#allocation6 + $0x20] sm:$0xff]  }
  0xde   : > { %vm585_vm3 = vcmp.lt.s32.totalorder %v561_v27, %v576_v45  ;;  %vm586_vm4 = vcmp.lt.s32.totalorder %v562_v28, %v576_v45  ;;  %vm590_vm5 = vcmp.lt.s32.totalorder %v562_v28, %v582_v46  ;;  %vm589_vm7 = vcmp.lt.s32.totalorder %v561_v27, %v582_v46 }
  0xdf   : > { %v593_v49 = vsel %vm585_vm3, 0.125, %v1900_v37  ;;  %v594_v50 = vsel %vm586_vm4, 0.125, %v1900_v37  ;;  %v598_v51 = vsel %vm590_vm5, 0.125, %v1900_v37  ;;  %v597_v63 = vsel %vm589_vm7, 0.125, %v1900_v37 }
  0xe0   : > { %v613_v52 = vmul.f32 %v605_v41, %v593_v49  ;;  %v618_v53 = vmul.f32 %v610_v42, %v598_v51  ;;  %v614_v55 = vmul.f32 %v606_v43, %v594_v50  ;;  %v617_v1 = vmul.f32 %v609_v60, %v597_v63  ;;  %v1718_v60 = vld [vmem:[#allocation6 + $0x28] sm:$0xff]  }
  0xe2   : > { %v620_v56 = vpack.c.bf16 %v614_v55, %v612_v54  ;;  %v619_v57 = vpack.c.bf16 %v613_v52, %v611_v48  ;;  %v622_v58 = vpack.c.bf16 %v618_v53, %v616_v47  ;;  %v621_v4 = vpack.c.bf16 %v617_v1, %v615_v0  ;;  %v1720_v1 = vld [vmem:[#allocation6 + $0x18] sm:$0xff]  }
  0xe4   : > { %793 = vmatprep.mubr.bf16.mxu0 %v620_v56 }
  0xe5   : > { %794 = vmatmul.mubr.bf16.vlgmr.msra.gmra.mxu0 %v619_v57  ;;  %v1717_v57 = vld [vmem:[#allocation6 + $0x30] sm:$0xff]  }
  0xe6   : > { %1558 = vmatpush3.bf16.msra.mxu0 %v1700_v25  ;;  %801 = vmatprep.mubr.bf16.mxu0 %v622_v58 }
  0xe7   : > { %1559 = vmatprep.subr.bf16.mxu0 %v1701_v61 }
  0xea   : > { %1560 = vmatpush3.bf16.msra.mxu0 %v1701_v61 }
  0xeb   : > { %1561 = vmatprep.subr.bf16.mxu0 %v1702_v2 }
  0xed   : > { %802 = vmatmul.mubr.bf16.gmra.mxu0 %v621_v4  ;;  %v1723_v4 = vld [vmem:[#allocation6] sm:$0xff]  }
  0xee   : > { %1562 = vmatpush3.bf16.msra.mxu0 %v1702_v2  ;;  %1563 = vmatprep.mubr.msk.bf16.mxu0 %vm838_vm8, %v1703_v3  ;;  %v1721_v2 = vld [vmem:[#allocation6 + $0x10] sm:$0xff]   ;;  %v1722_v3 = vld [vmem:[#allocation6 + $0x8] sm:$0xff]  }
  0xef   : > { %1587 = vmatprep.subr.bf16.mxu0 %v1704_v5 }
  0xf5   : > { %1564 = vmatmul.mubr.msk.bf16.vlgmr.msra.gmra.mxu0 %vm838_vm8, %v1683_v6 }
  0xf6   : > { %1588 = vmatpush3.bf16.msra.mxu0 %v1704_v5  ;;  %1591 = vmatprep.mubr.msk.bf16.mxu0 %vm1072_vm9, %v1706_v7 }
  0xf7   : > { %1589 = vmatprep.subr.bf16.mxu0 %v1705_v8 }
  0xfa   : > { %1590 = vmatpush3.bf16.msra.mxu0 %v1705_v8 }
  0xfd   : > { %1592 = vmatmul.mubr.msk.bf16.vlgmr.msra.gmra.mxu0 %vm1072_vm9, %v1707_v9 }
 0x1a5   : > { %v1516_v19 = vpop.f32.mrf.mxu0 }
 0x1a7   : > { %v1517_v20 = vpop.f32.mrf.mxu0 }
 0x1a8   : > { %v1518_v28 = vadd.f32 %v1517_v20, %v1516_v19 }
 0x1a9   : > { %v1519_v21 = vpop.f32.mrf.mxu0 }
 0x1ab   : > { %v1520_v22 = vpop.f32.mrf.mxu0 }
 0x1ac   : > { %v1521_v36 = vadd.f32 %v1520_v22, %v1519_v21 }
 0x1ad   : > { %v1522_v23 = vpop.f32.mrf.mxu0 }
 0x1af   : > { %v1523_v24 = vpop.f32.mrf.mxu0 }
 0x1b0   : > { %v1524_v29 = vadd.f32 %v1523_v24, %v1522_v23 }
 0x1b1   : > { %v1525_v25 = vpop.f32.mrf.mxu0 }
 0x1b3   : > { %v1526_v26 = vpop.f32.mrf.mxu0 }
 0x1b4   : > { %v1527_v31 = vadd.f32 %v1526_v26, %v1525_v25 }
 0x1b5   : > { %v1565_v27 = vpop.f32.mrf.mxu0 }
 0x1b6   : > { %v888_v33 = vadd.f32 %v1565_v27, %v1524_v29 }
 0x1b7   : > { %v879_v30 = vpop.f32.mrf.mxu0 }
 0x1b8   : > { %v880_v32 = vadd.f32 %v1518_v28, %v879_v30  ;;  %v903_v42 = vadd.f32 %v1466_v34, %v888_v33 }
 0x1b9   : > { %v1566_v35 = vpop.f32.mrf.mxu0 }
 0x1ba   : > { %v901_v37 = vadd.f32 %v1466_v34, %v880_v32  ;;  %v891_v38 = vadd.f32 %v1566_v35, %v1527_v31 }
 0x1bb   : > { %v882_v39 = vpop.f32.mrf.mxu0 }
 0x1bc   : > { %v904_v40 = vadd.f32 %v1466_v34, %v891_v38  ;;  %v883_v41 = vadd.f32 %v1521_v36, %v882_v39  ;;  %1724 = vtanh.f32 %v901_v37 }
 0x1bd   : > { %v1593_v43 = vpop.f32.mrf.mxu0 }
 0x1be   : > { %v902_v45 = vadd.f32 %v1466_v34, %v883_v41  ;;  %1726 = vtanh.f32 %v904_v40  ;;  %v1122_v63 = vadd.f32 %v1593_v43, %v1476_v44 }
 0x1bf   : > { %v1113_v46 = vpop.f32.mrf.mxu0 }
 0x1c0   : > { %1728 = vtanh.f32 %v902_v45  ;;  %v1114_v47 = vadd.f32 %v1476_v44, %v1113_v46 }
 0x1c1   : > { %1730 = vtanh.f32 %v903_v42  ;;  %v1594_v48 = vpop.f32.mrf.mxu0 }
 0x1c2   : > { %1732 = vtanh.f32 %v1114_v47  ;;  %v1125_v0 = vadd.f32 %v1594_v48, %v1476_v44 }
 0x1c3   : > { %v1116_v49 = vpop.f32.mrf.mxu0 }
 0x1c4   : > { %v1117_v50 = vadd.f32 %v1476_v44, %v1116_v49 }
 0x1c6   : > { %1734 = vtanh.f32 %v1117_v50 }
 0x1c7   : > { %1736 = vtanh.f32 %v1122_v63 }
 0x1c8   : > { %1738 = vtanh.f32 %v1125_v0 }
 0x1c9   : > { %v1725_v51 = vpop.eup %1724 }
 0x1cb   : > { %v1727_v52 = vpop.eup %1726 }
 0x1cd   : > { %v1729_v53 = vpop.eup %1728 }
 0x1ce   : > { %v1731_v54 = vpop.eup %1730  ;;  %v909_v55 = vpack.c.bf16 %v1729_v53, %v1725_v51 }
 0x1cf   : > { %v910_v56 = vpack.c.bf16 %v1727_v52, %v1731_v54  ;;  %v1733_v58 = vpop.eup %1732 }
 0x1d0   : > { %1583 = vmatprep.mubr.bf16.mxu1 %v909_v55 }
 0x1d1   : > { %1584 = vmatmul.mubr.bf16.vlgmr.msra.gmra.mxu1 %v910_v56 }
 0x1d2   : > { %1596 = vmatpush3.bf16.msra.mxu1 %v1716_v18 }
 0x1d3   : > { %v1735_v59 = vpop.eup %1734  ;;  %1597 = vmatprep.subr.bf16.mxu1 %v1717_v57 }
 0x1d4   : > { %v1132_v61 = vpack.c.bf16 %v1735_v59, %v1733_v58  ;;  %v1737_v5 = vpop.eup %1736 }
 0x1d5   : > { %v1739_v6 = vpop.eup %1738 }
 0x1d6   : > { %1598 = vmatpush3.bf16.msra.mxu1 %v1717_v57  ;;  %1611 = vmatprep.mubr.bf16.mxu1 %v1132_v61  ;;  %v1133_v7 = vpack.c.bf16 %v1739_v6, %v1737_v5 }
 0x1d7   : > { %1599 = vmatprep.subr.bf16.mxu1 %v1718_v60 }
 0x1da   : > { %1600 = vmatpush3.bf16.msra.mxu1 %v1718_v60 }
 0x1db   : > { %1601 = vmatprep.subr.bf16.mxu1 %v1719_v62 }
 0x1de   : > { %1602 = vmatpush3.bf16.msra.mxu1 %v1719_v62 }
 0x1df   : > { %1603 = vmatprep.subr.bf16.mxu1 %v1720_v1 }
 0x1e2   : > { %1604 = vmatpush3.bf16.msra.mxu1 %v1720_v1 }
 0x1e3   : > { %1605 = vmatprep.subr.bf16.mxu1 %v1721_v2 }
 0x1e6   : > { %1606 = vmatpush3.bf16.msra.mxu1 %v1721_v2 }
 0x1e7   : > { %1607 = vmatprep.subr.bf16.mxu1 %v1722_v3 }
 0x1ea   : > { %1608 = vmatpush3.bf16.msra.mxu1 %v1722_v3 }
 0x1eb   : > { %1609 = vmatprep.subr.bf16.mxu1 %v1723_v4 }
 0x1ee   : > { %1610 = vmatpush3.bf16.msra.mxu1 %v1723_v4 }
 0x1f1   : > { %1612 = vmatmul.mubr.bf16.vlgmr.msra.gmra.mxu1 %v1133_v7 }
 0x291   : > { %v1585_v8 = vpop.f32.mrf.mxu1 }
 0x292   : > { %v1025_v16 = vadd.f32 %v1585_v8, %v1467_v12 }
 0x293   : > { %v1016_v9 = vpop.f32.mrf.mxu1 }
 0x294   : > { %v1017_v13 = vadd.f32 %v1467_v12, %v1016_v9 }
 0x295   : > { %v1586_v10 = vpop.f32.mrf.mxu1 }
 0x296   : > { %1740 = vtanh.f32 %v1017_v13  ;;  %v1028_v25 = vadd.f32 %v1586_v10, %v1467_v12 }
 0x297   : > { %v1019_v11 = vpop.f32.mrf.mxu1 }
 0x298   : > { %v1020_v20 = vadd.f32 %v1467_v12, %v1019_v11 }
 0x2a3   : > { %v1741_v26 = vpop.eup %1740 }
 0x2b1   : > { %v1613_v14 = vpop.f32.mrf.mxu1 }
 0x2b2   : > { %v1248_v18 = vadd.f32 %v1613_v14, %v1483_v15 }
 0x2b3   : > { %v1239_v17 = vpop.f32.mrf.mxu1 }
 0x2b4   : > { %v1240_v19 = vadd.f32 %v1483_v15, %v1239_v17 }
 0x2b5   : > { %v1614_v21 = vpop.f32.mrf.mxu1 }
 0x2b6   : > { %1742 = vtanh.f32 %v1240_v19  ;;  %v1251_v23 = vadd.f32 %v1614_v21, %v1483_v15 }
 0x2b7   : > { %1744 = vtanh.f32 %v1025_v16  ;;  %v1242_v22 = vpop.f32.mrf.mxu1 }
 0x2b8   : > { %1746 = vtanh.f32 %v1248_v18  ;;  %v1243_v24 = vadd.f32 %v1483_v15, %v1242_v22 }
 0x2b9   : > { %1748 = vtanh.f32 %v1020_v20 }
 0x2ba   : > { %1750 = vtanh.f32 %v1243_v24 }
 0x2bb   : > { %1752 = vtanh.f32 %v1251_v23 }
 0x2bc   : > { %1754 = vtanh.f32 %v1028_v25 }
 0x2c3   : > { %v1743_v27 = vpop.eup %1742 }
 0x2c4   : > { %v1745_v28 = vpop.eup %1744  ;;  %v1258_v29 = vmul.f32 %v1743_v27, %v1741_v26 }
 0x2c5   : > { %v1747_v30 = vpop.eup %1746 }
 0x2c6   : > { %v1749_v31 = vpop.eup %1748  ;;  %1262 = vadd.xlane.f32.xlu0 %v1258_v29  ;;  %v1260_v34 = vmul.f32 %v1747_v30, %v1745_v28 }
 0x2c7   : > { %v1751_v32 = vpop.eup %1750 }
 0x2c8   : > { %v1259_v33 = vmul.f32 %v1751_v32, %v1749_v31  ;;  %v1753_v35 = vpop.eup %1752 }
 0x2c9   : > { %v1755_v36 = vpop.eup %1754 }
 0x2ca   : > { %1264 = vadd.xlane.f32.xlu1 %v1259_v33  ;;  %1266 = vadd.xlane.f32.xlu0 %v1260_v34  ;;  %v1261_v37 = vmul.f32 %v1755_v36, %v1753_v35 }
 0x2ce   : > { %1268 = vadd.xlane.f32.xlu0 %v1261_v37 }
 0x34f   : > { %v1263_v38 = vpop.xlane.xlu0 %1262 }
 0x350   : > { %v1492_v39 = vmul.f32 -1.442695, %v1263_v38 }
 0x352   : > { %1756 = vpow2.f32 %v1492_v39 }
 0x353   : > { %v1265_v40 = vpop.xlane.xlu1 %1264  ;;  %v1267_v41 = vpop.xlane.xlu0 %1266 }
 0x354   : > { %v1493_v42 = vmul.f32 -1.442695, %v1265_v40  ;;  %v1494_v43 = vmul.f32 -1.442695, %v1267_v41 }
 0x356   : > { %1758 = vpow2.f32 %v1493_v42 }
 0x357   : > { %1760 = vpow2.f32 %v1494_v43  ;;  %v1269_v44 = vpop.xlane.xlu0 %1268 }
 0x358   : > { %v1495_v45 = vmul.f32 -1.442695, %v1269_v44 }
 0x35a   : > { %1762 = vpow2.f32 %v1495_v45 }
 0x35f   : > { %v1757_v46 = vpop.eup %1756 }
 0x360   : > { %v1282_v47 = vadd.f32 1.0, %v1757_v46 }
 0x362   : > { %1764 = vrcp.f32 %v1282_v47 }
 0x363   : > { %v1759_v48 = vpop.eup %1758 }
 0x364   : > { %v1761_v49 = vpop.eup %1760  ;;  %v1283_v50 = vadd.f32 1.0, %v1759_v48 }
 0x365   : > { %v1284_v51 = vadd.f32 1.0, %v1761_v49 }
 0x366   : > { %1766 = vrcp.f32 %v1283_v50 }
 0x367   : > { %v1763_v52 = vpop.eup %1762  ;;  %1768 = vrcp.f32 %v1284_v51 }
 0x368   : > { %v1285_v53 = vadd.f32 1.0, %v1763_v52 }
 0x36a   : > { %1770 = vrcp.f32 %v1285_v53 }
 0x36f   : > { %v1765_v54 = vpop.eup %1764 }
 0x370   : > { %1295 = vst.msk [vmem:[%s557_s11] sm:$0xff] %vm1294_vm10, %v1765_v54 }
 0x373   : > { %v1767_v55 = vpop.eup %1766 }
 0x374   : > { %v1769_v56 = vpop.eup %1768  ;;  %1296 = vst.msk [vmem:[%s557_s11 + $0x8] sm:$0xff] %vm1294_vm10, %v1767_v55 }
 0x375   : > { %1297 = vst.msk [vmem:[%s557_s11 + $0x10] sm:$0xff] %vm1294_vm10, %v1769_v56 }
 0x377   : > { %v1771_v57 = vpop.eup %1770 }
 0x378   : > { %1298 = vst.msk [vmem:[%s557_s11 + $0x18] sm:$0xff] %vm1294_vm10, %v1771_v57 }
 0x379 PF: > { %s2256_s16 = sld [smem:[#allocation9_spill]]  ;;  %p24_p10 = scmp.ge.s32.totalorder %s2036_s17, 4  }
 0x37a   : > { %s2257_s25 = smov %s1882_s26  ;;  %s2258_s26 = smov %s1886_s27 }
 0x37b   : > { %s2260_s28 = smov %s2036_s17  ;;  %26 = sbr.rel (!%p24_p10) target bundleno = 8 (0x8), region = 129 }
 0x37f   : > { %s2259_s27 = smov %s2256_s16 }
 0x380   :  { %1321 = vsyncpa [#allocation3], 1 }
 0x381   :  { %1323 = vsyncpa [#allocation3 + $0x1], 1 }
 0x382   :  { %1324 = vsyncpa [#allocation5], 1 }

</bundles_post_ra>
